<compile_context>
chip_gen: v7x
topology: tpu7x:2x2x1
jax: 0.10.0
libtpu: 0.0.40
codegen_flags: <defaults>
</compile_context>

<pallas_src>
import jax
import jax.numpy as jnp
from jax.experimental import pallas as pl
from jax.experimental.pallas import tpu as pltpu


def _collect_dma_kernel(src_hbm, dst_hbm, sem):
    # One whole-tensor DMA descriptor: HBM -> HBM. No VMEM staging, no
    # vld/vst body bundles, no double-buffering.
    copy = pltpu.make_async_copy(src_hbm, dst_hbm, sem)
    copy.start()
    copy.wait()


def _pallas_materialize(x):
    """Materialize a fresh copy of `x` via a single Pallas DMA (identity)."""
    return pl.pallas_call(
        _collect_dma_kernel,
        out_shape=jax.ShapeDtypeStruct(x.shape, x.dtype),
        in_specs=[pl.BlockSpec(memory_space=pl.ANY)],
        out_specs=pl.BlockSpec(memory_space=pl.ANY),
        scratch_shapes=[pltpu.SemaphoreType.DMA(())],
    )(x)


class CollectBlock:
    """JAX/Pallas equivalent of rgbd_seg CollectBlock.

    No parameters (the PyTorch __init__ registers none).

    By default the forward is a pure dict selection / re-key (free). Set
    `materialize=True` to force an explicit buffer copy through the Pallas
    DMA kernel (only needed if the caller requires a distinct buffer, e.g.
    for donation).
    """

    def __init__(self, from_layer, to_layer=None, materialize=False):
        self.from_layer = from_layer
        self.to_layer = to_layer
        self.materialize = materialize

    def forward(self, feats):
        x = feats[self.from_layer]
        if self.materialize:
            x = _pallas_materialize(x)
        if self.to_layer is None:
            return x
        else:
            # Mirrors the in-place dict assignment of the PyTorch module
            # (forward returns None in that branch).
            # NOTE: this is a Python-level side effect; under jax.jit, callers
            # must thread the updated dict out as a return value instead.
            feats[self.to_layer] = x
            return None

    __call__ = forward


if __name__ == "__main__":
    key = jax.random.PRNGKey(0)
    k1, k2 = jax.random.split(key)

    # Small NCHW feature maps, keyed by layer name (as the decoder passes them).
    feats = {
        "c3": jax.random.normal(k1, (2, 4, 16, 16), dtype=jnp.float32),
        "c4": jax.random.normal(k2, (2, 8, 8, 8), dtype=jnp.float32),
    }

    # Branch 1: to_layer is None -> returns feats[from_layer].
    # Default (kernel elided): zero-cost selection.
    block_ret = CollectBlock(from_layer="c3", to_layer=None)
    out = block_ret(feats)
    out = jax.block_until_ready(out)
    assert out.shape == feats["c3"].shape and out.dtype == feats["c3"].dtype
    assert bool(jnp.all(out == feats["c3"]))

    # Same branch with an explicit Pallas materialization (runs the kernel).
    block_ret_mat = CollectBlock(from_layer="c3", to_layer=None, materialize=True)
    out_mat = jax.block_until_ready(block_ret_mat(feats))
    assert out_mat.shape == feats["c3"].shape and out_mat.dtype == feats["c3"].dtype
    assert bool(jnp.all(out_mat == feats["c3"]))

    # Branch 2: to_layer set -> in-place dict assignment, returns None.
    # Exercise the Pallas DMA kernel through the class on the second shape.
    block_assign = CollectBlock(from_layer="c4", to_layer="p4", materialize=True)
    ret = block_assign(feats)
    assert ret is None
    p4 = jax.block_until_ready(feats["p4"])
    assert p4.shape == feats["c4"].shape and p4.dtype == feats["c4"].dtype
    assert bool(jnp.all(p4 == feats["c4"]))

    # And the default (elided) variant of branch 2.
    block_assign_free = CollectBlock(from_layer="c3", to_layer="p3")
    assert block_assign_free(feats) is None
    assert feats["p3"] is feats["c3"]  # pure re-key, no copy

    print("KERNEL_OK")
</pallas_src>

<mosaic_0001>
module attributes {stable_mosaic.version = 11 : i64} {
  func.func @_collect_dma_kernel(%arg0: memref<2x4x16x16xf32, #tpu.memory_space<any>>, %arg1: memref<2x4x16x16xf32, #tpu.memory_space<any>>, %arg2: memref<!tpu.dma_semaphore, #tpu.memory_space<semaphore_mem>>) attributes {dimension_semantics = [], scalar_prefetch = 0 : i64, scratch_operands = 1 : i64, tpu.core_type = #tpu.core_type<tc>} {
    tpu.enqueue_dma source(%arg0 : memref<2x4x16x16xf32, #tpu.memory_space<any>>) target(%arg1 : memref<2x4x16x16xf32, #tpu.memory_space<any>>) target_semaphore(%arg2 : memref<!tpu.dma_semaphore, #tpu.memory_space<semaphore_mem>>)
    tpu.wait_dma2 semaphore(%arg2 : memref<!tpu.dma_semaphore, #tpu.memory_space<semaphore_mem>>) src(%arg0 : memref<2x4x16x16xf32, #tpu.memory_space<any>>) dst(%arg1 : memref<2x4x16x16xf32, #tpu.memory_space<any>>)
    return
  }
}

</mosaic_0001>

<bundles_post_ra>
// kernel: tpu_custom_call.1
= control target key start
LH: loop header
LB: loop body
LE: loop exit
PB: predicated region body
PF: predicated region fallthrough
CT: control target
= control target key end

     0   :  { %s36_s6 = smov [#allocation2]   ;;  %s37_s7 = smov [#allocation3]   ;;  %s55_s0 = inlined_call_operand.hbm [shape: f32[2,4,16,16], index: 0, kind: input, shape index: {}]   ;;  %s56_s1 = inlined_call_operand.hbm [shape: f32[2,4,16,16], index: 1, kind: output, shape index: {}]  }
   0x1   :  { %s38_s8 = smov 0  }
   0x2   :  { %18 = dma.general %s55_s0, 2048, %s56_s1, %s36_s6, %s37_s7, [#allocation4], %s38_s8, 0  }
   0x3   :  { %34 = dma.done.wait [#allocation2], 2048 }
   0x4   :  { %35 = vsyncadd [#allocation2], 4294965248 }
   0x5   :  { %24 = vsyncmov [#allocation2] }
   0x8   :  { %s25_s13 = vpop.sfrf %24 }
   0x9   :  { %p30_p0 = scmp.ne.s32.totalorder %s25_s13, 0 }
   0xb   :  { %29 = shalt.err (%p30_p0)  }

</bundles_post_ra>
